<compile_context>
chip_gen: v5e
topology: v5e:2x2
jax: 0.10.0
libtpu: 0.0.40
codegen_flags: <defaults>
</compile_context>

<pallas_src>
import jax
import jax.numpy as jnp
from jax.experimental import pallas as pl
from jax.experimental.pallas import tpu as pltpu


def _mvitv2_attn_kernel(x_ref, wi_ref, bi_ref, wk_ref, bk_ref, wv_ref, bv_ref,
                        wo_ref, bo_ref, o_ref):
    x = x_ref[...]                                          # (TB, NQ, D)

    # ---- fc_i on VPU + XLU: logits = sum_d x * wi_row + bi  (no MXU) --------
    # wi_row / bi are kept in f32, so the product promotes to f32.
    xw = x * wi_ref[...]                                    # (TB, NQ, D) f32
    logits = jnp.sum(xw, axis=-1, keepdims=True) + bi_ref[...]   # (TB, NQ, 1)

    # ---- softmax over the sequence axis -------------------------------------
    m = jnp.max(logits, axis=1, keepdims=True)              # (TB, 1, 1)
    e = jnp.exp(logits - m)                                 # (TB, NQ, 1)
    denom = jnp.sum(e, axis=1, keepdims=True)               # (TB, 1, 1)

    # ---- softmax-weighted pooling of x, with Wk hoisted past the pooling ----
    # sum_n w_n (x_n @ Wk + bk) == (sum_n w_n x_n) @ Wk + bk  (weights sum to 1)
    pooled = jnp.sum(e * x.astype(jnp.float32), axis=1, keepdims=True) / denom
    pooled = pooled.astype(wk_ref.dtype)                    # (TB, 1, D)
    ctx = jnp.einsum("bqd,de->bqe", pooled, wk_ref[...],
                     preferred_element_type=jnp.float32) + bk_ref[...]

    # ---- value projection, context modulation, output projection ------------
    v = jnp.einsum("bnd,de->bne", x, wv_ref[...],
                   preferred_element_type=jnp.float32) + bv_ref[...]
    vmod = (v * ctx).astype(wo_ref.dtype)                   # (TB, NQ, D)
    out = jnp.einsum("bnd,de->bne", vmod, wo_ref[...],
                     preferred_element_type=jnp.float32) + bo_ref[...]
    o_ref[...] = out.astype(o_ref.dtype)


def _choose_tb(B, NQ, D, *, x_bytes, out_bytes, resident_bytes,
               vmem_budget=44 << 20, target_x_block_bytes=2 << 20):
    """Largest TB dividing B such that resident weights + double-buffered
    x/out blocks + f32 intermediates stay within the VMEM budget and the
    x block reaches ~2 MiB (past that, per-step pipeline overhead is already
    amortized).  Prefers an even grid-step count (v7x has 2 TensorCores on the
    parallel axis) when that does not shrink the tile by more than 2x.
    Single-TC chips (v5e/v6e) are NOT forced to >= 2 steps."""
    candidates = []
    for tb in range(1, B + 1):
        if B % tb:
            continue
        rows = tb * NQ
        xblk = rows * D * x_bytes
        oblk = rows * D * out_bytes
        interm = rows * D * 4 * 4  # f32 v/vmod + slack for compiler temporaries
        total = resident_bytes + 2 * (xblk + oblk) + interm
        if total > vmem_budget:
            break
        candidates.append(tb)
        if xblk >= target_x_block_bytes:
            break
    if not candidates:
        return 1
    best = candidates[-1]
    steps = B // best
    if steps > 1 and steps % 2 == 1:
        for tb in reversed(candidates):
            if (B // tb) % 2 == 0 and tb * 2 >= best:
                return tb
    return best


def prepare_params(p, *, compute_dtype=jnp.float32):
    """One-time conversion of math-layout params (from init_params) into the
    kernel-ready form: matmul weights cast to compute_dtype (bf16 recommended
    on v5e/v6e/v7x: MXU is bf16-native and the x HBM read halves; softmax,
    pooling, bias adds and accumulation always stay f32), biases / fc_i row
    kept in f32, shapes rank-matched for in-kernel broadcasting."""
    D = p["wk"].shape[0]
    cd = jnp.dtype(compute_dtype)
    return {
        "wi_row": jnp.asarray(p["wi"]).reshape(1, 1, D).astype(jnp.float32),
        "bi": jnp.asarray(p["bi"]).reshape(1, 1, 1).astype(jnp.float32),
        "wk": jnp.asarray(p["wk"]).astype(cd),
        "bk": jnp.asarray(p["bk"]).reshape(1, 1, D).astype(jnp.float32),
        "wv": jnp.asarray(p["wv"]).astype(cd),
        "bv": jnp.asarray(p["bv"]).reshape(1, 1, D).astype(jnp.float32),
        "wo": jnp.asarray(p["wo"]).astype(cd),
        "bo": jnp.asarray(p["bo"]).reshape(1, 1, D).astype(jnp.float32),
    }


def mobilevitv2_attention(x, prepared, *, tb=None, out_dtype=None):
    """x: (B, NQ, D).  prepared: dict from prepare_params().

    out_dtype: output dtype (defaults to x.dtype); pass bf16 on v6e to halve
    the output HBM store when the consumer tolerates it.
    """
    B, NQ, D = x.shape
    compute_dtype = prepared["wv"].dtype
    if out_dtype is None:
        out_dtype = x.dtype
    cbytes = jnp.dtype(compute_dtype).itemsize
    obytes = jnp.dtype(out_dtype).itemsize

    # No-op when the activation dtype already matches (keep the network in
    # compute_dtype to avoid this extra HBM pass entirely).
    x_c = x.astype(compute_dtype)

    # Resident (single-buffered) weights/biases: wk, wv, wo + f32 row/biases.
    resident = 3 * D * D * cbytes + (4 * D + 2) * 4
    # NOTE: for very large D (e.g. Dp >= ~1536 in f32 on v7x's 64 MiB VMEM)
    # the weights should be K-tiled via pipelined BlockSpecs instead of being
    # fully resident; not needed at typical MobileViT widths.

    if tb is None:
        tb = _choose_tb(B, NQ, D, x_bytes=cbytes, out_bytes=obytes,
                        resident_bytes=resident)
    assert B % tb == 0

    rows = tb * NQ
    need = resident + 2 * rows * D * (cbytes + obytes) + 4 * rows * D * 4
    vmem_limit = int(min(max(2 * need, 32 << 20), 60 << 20))

    vmem_spec = pl.BlockSpec(memory_space=pltpu.MemorySpace.VMEM)

    return pl.pallas_call(
        _mvitv2_attn_kernel,
        out_shape=jax.ShapeDtypeStruct((B, NQ, D), out_dtype),
        grid_spec=pltpu.PrefetchScalarGridSpec(
            num_scalar_prefetch=0,
            grid=(B // tb,),
            in_specs=[
                pl.BlockSpec((tb, NQ, D), lambda b: (b, 0, 0)),  # x (blocked)
                vmem_spec,  # wi_row (f32, VPU path)
                vmem_spec,  # bi
                vmem_spec,  # wk
                vmem_spec,  # bk
                vmem_spec,  # wv
                vmem_spec,  # bv
                vmem_spec,  # wo
                vmem_spec,  # bo
            ],
            out_specs=pl.BlockSpec((tb, NQ, D), lambda b: (b, 0, 0)),
        ),
        compiler_params=pltpu.CompilerParams(
            dimension_semantics=("parallel",),
            vmem_limit_bytes=vmem_limit),
    )(x_c, prepared["wi_row"], prepared["bi"], prepared["wk"], prepared["bk"],
      prepared["wv"], prepared["bv"], prepared["wo"], prepared["bo"])


def init_params(key, d_model):
    """Matches nn.Linear init in the module: weight ~ N(0, 0.001), bias = 0.
    Weights stored pre-transposed as (in_features, out_features)."""
    k_i, k_k, k_v, k_o = jax.random.split(key, 4)
    std = 0.001
    return {
        "wi": (jax.random.normal(k_i, (1, d_model)) * std).T,        # (D, 1)
        "bi": jnp.zeros((1, 1), jnp.float32),
        "wk": (jax.random.normal(k_k, (d_model, d_model)) * std).T,  # (D, D)
        "bk": jnp.zeros((1, d_model), jnp.float32),
        "wv": (jax.random.normal(k_v, (d_model, d_model)) * std).T,
        "bv": jnp.zeros((1, d_model), jnp.float32),
        "wo": (jax.random.normal(k_o, (d_model, d_model)) * std).T,
        "bo": jnp.zeros((1, d_model), jnp.float32),
    }


def reference(x, p):
    """Pure-JAX reference of the PyTorch forward, for correctness check."""
    i = x @ p["wi"] + p["bi"]                       # (B, NQ, 1)
    w = jax.nn.softmax(i, axis=1)
    k = x @ p["wk"] + p["bk"]
    ctx = jnp.sum(w * k, axis=1, keepdims=True)     # (B, 1, D)
    v = (x @ p["wv"] + p["bv"]) * ctx
    return v @ p["wo"] + p["bo"]


if __name__ == "__main__":
    key = jax.random.PRNGKey(0)
    k_x, k_p = jax.random.split(key)

    B, NQ, D = 2, 8, 32
    x = jax.random.normal(k_x, (B, NQ, D), dtype=jnp.float32)

    # 1) Module-faithful init (weight std=0.001, zero bias), exact f32 path.
    params = init_params(k_p, D)
    ref = reference(x, params)
    out = jax.block_until_ready(
        mobilevitv2_attention(x, prepare_params(params)))
    assert out.shape == (B, NQ, D)
    assert jnp.allclose(out, ref, atol=1e-5, rtol=1e-5)

    # 2) Larger-magnitude weights so the check is numerically non-trivial.
    params2 = {k: (v * 100.0 if k.startswith("w") else v)
               for k, v in params.items()}
    ref2 = reference(x, params2)
    out2 = jax.block_until_ready(
        mobilevitv2_attention(x, prepare_params(params2)))
    assert jnp.allclose(out2, ref2, atol=1e-4, rtol=1e-4)

    # 3) bf16 MXU-input path (recommended on v5e / v6e / v7x); accumulation,
    #    softmax and pooling stay f32, so only a loose tolerance is needed.
    out_bf16 = jax.block_until_ready(
        mobilevitv2_attention(
            x, prepare_params(params2, compute_dtype=jnp.bfloat16)))
    assert jnp.allclose(out_bf16, ref2, atol=5e-2, rtol=5e-2)

    print("KERNEL_OK")
</pallas_src>

<mosaic_0001>
module attributes {stable_mosaic.version = 11 : i64} {
  func.func @_mvitv2_attn_kernel(%arg0: i32, %arg1: memref<2x8x32xf32, #tpu.memory_space<vmem>>, %arg2: memref<1x1x32xf32, #tpu.memory_space<vmem>>, %arg3: memref<1x1x1xf32, #tpu.memory_space<vmem>>, %arg4: memref<32x32xf32, #tpu.memory_space<vmem>>, %arg5: memref<1x1x32xf32, #tpu.memory_space<vmem>>, %arg6: memref<32x32xf32, #tpu.memory_space<vmem>>, %arg7: memref<1x1x32xf32, #tpu.memory_space<vmem>>, %arg8: memref<32x32xf32, #tpu.memory_space<vmem>>, %arg9: memref<1x1x32xf32, #tpu.memory_space<vmem>>, %arg10: memref<2x8x32xf32, #tpu.memory_space<vmem>>) attributes {dimension_semantics = [#tpu.dimension_semantics<parallel>], iteration_bounds = array<i64: 1>, scalar_prefetch = 0 : i64, scratch_operands = 0 : i64, tpu.core_type = #tpu.core_type<tc>, window_params = [{transform_indices = @transform_0, window_bounds = array<i64: 2, 8, 32>}, {pipeline_mode = #tpu.pipeline_mode<synchronous>, transform_indices = @transform_1, window_bounds = array<i64: 1, 1, 32>}, {pipeline_mode = #tpu.pipeline_mode<synchronous>, transform_indices = @transform_2, window_bounds = array<i64: 1, 1, 1>}, {pipeline_mode = #tpu.pipeline_mode<synchronous>, transform_indices = @transform_3, window_bounds = array<i64: 32, 32>}, {pipeline_mode = #tpu.pipeline_mode<synchronous>, transform_indices = @transform_4, window_bounds = array<i64: 1, 1, 32>}, {pipeline_mode = #tpu.pipeline_mode<synchronous>, transform_indices = @transform_5, window_bounds = array<i64: 32, 32>}, {pipeline_mode = #tpu.pipeline_mode<synchronous>, transform_indices = @transform_6, window_bounds = array<i64: 1, 1, 32>}, {pipeline_mode = #tpu.pipeline_mode<synchronous>, transform_indices = @transform_7, window_bounds = array<i64: 32, 32>}, {pipeline_mode = #tpu.pipeline_mode<synchronous>, transform_indices = @transform_8, window_bounds = array<i64: 1, 1, 32>}, {transform_indices = @transform_9, window_bounds = array<i64: 2, 8, 32>}]} {
    %c0 = arith.constant 0 : index
    %c0_0 = arith.constant 0 : index
    %c0_1 = arith.constant 0 : index
    %0 = vector.load %arg1[%c0, %c0_0, %c0_1] : memref<2x8x32xf32, #tpu.memory_space<vmem>>, vector<2x8x32xf32>
    %c0_2 = arith.constant 0 : index
    %c0_3 = arith.constant 0 : index
    %c0_4 = arith.constant 0 : index
    %1 = vector.load %arg2[%c0_2, %c0_3, %c0_4] : memref<1x1x32xf32, #tpu.memory_space<vmem>>, vector<1x1x32xf32>
    %2 = vector.broadcast %1 : vector<1x1x32xf32> to vector<2x8x32xf32>
    %3 = arith.mulf %0, %2 : vector<2x8x32xf32>
    %cst = arith.constant dense<0.000000e+00> : vector<2x8xf32>
    %4 = vector.multi_reduction <add>, %3, %cst [2] : vector<2x8x32xf32> to vector<2x8xf32>
    %5 = vector.shape_cast %4 : vector<2x8xf32> to vector<2x8x1xf32>
    %c0_5 = arith.constant 0 : index
    %c0_6 = arith.constant 0 : index
    %c0_7 = arith.constant 0 : index
    %6 = vector.load %arg3[%c0_5, %c0_6, %c0_7] : memref<1x1x1xf32, #tpu.memory_space<vmem>>, vector<1x1x1xf32>
    %7 = vector.broadcast %6 : vector<1x1x1xf32> to vector<2x8x1xf32>
    %8 = arith.addf %5, %7 : vector<2x8x1xf32>
    %cst_8 = arith.constant dense<0xFF800000> : vector<2x1xf32>
    %9 = vector.multi_reduction <maximumf>, %8, %cst_8 [1] : vector<2x8x1xf32> to vector<2x1xf32>
    %10 = vector.shape_cast %9 : vector<2x1xf32> to vector<2x1x1xf32>
    %11 = vector.broadcast %10 : vector<2x1x1xf32> to vector<2x8x1xf32>
    %12 = arith.subf %8, %11 : vector<2x8x1xf32>
    %13 = math.exp %12 : vector<2x8x1xf32>
    %cst_9 = arith.constant dense<0.000000e+00> : vector<2x1xf32>
    %14 = vector.multi_reduction <add>, %13, %cst_9 [1] : vector<2x8x1xf32> to vector<2x1xf32>
    %15 = vector.shape_cast %14 : vector<2x1xf32> to vector<2x1x1xf32>
    %16 = vector.broadcast %13 : vector<2x8x1xf32> to vector<2x8x32xf32>
    %17 = arith.mulf %16, %0 : vector<2x8x32xf32>
    %cst_10 = arith.constant dense<0.000000e+00> : vector<2x32xf32>
    %18 = vector.multi_reduction <add>, %17, %cst_10 [1] : vector<2x8x32xf32> to vector<2x32xf32>
    %19 = vector.shape_cast %18 : vector<2x32xf32> to vector<2x1x32xf32>
    %20 = vector.broadcast %15 : vector<2x1x1xf32> to vector<2x1x32xf32>
    %21 = arith.divf %19, %20 : vector<2x1x32xf32>
    %c0_11 = arith.constant 0 : index
    %c0_12 = arith.constant 0 : index
    %22 = vector.load %arg4[%c0_11, %c0_12] : memref<32x32xf32, #tpu.memory_space<vmem>>, vector<32x32xf32>
    "tpu.trace_start"() <{level = 10 : i32, message = "bqd,de->bqe"}> : () -> ()
    %cst_13 = arith.constant dense<0.000000e+00> : vector<2x1x32xf32>
    %23 = tpu.matmul %21, %22, %cst_13 {dimension_numbers = #tpu.dot_dimension_numbers<[2], [0], [0, 1], [1], [0, 0, 0, 1, 1, 1], [], []>} : vector<2x1x32xf32>, vector<32x32xf32>, vector<2x1x32xf32> -> vector<2x1x32xf32>
    "tpu.trace_stop"() : () -> ()
    %c0_14 = arith.constant 0 : index
    %c0_15 = arith.constant 0 : index
    %c0_16 = arith.constant 0 : index
    %24 = vector.load %arg5[%c0_14, %c0_15, %c0_16] : memref<1x1x32xf32, #tpu.memory_space<vmem>>, vector<1x1x32xf32>
    %25 = vector.broadcast %24 : vector<1x1x32xf32> to vector<2x1x32xf32>
    %26 = arith.addf %23, %25 : vector<2x1x32xf32>
    %c0_17 = arith.constant 0 : index
    %c0_18 = arith.constant 0 : index
    %27 = vector.load %arg6[%c0_17, %c0_18] : memref<32x32xf32, #tpu.memory_space<vmem>>, vector<32x32xf32>
    "tpu.trace_start"() <{level = 10 : i32, message = "bnd,de->bne"}> : () -> ()
    %cst_19 = arith.constant dense<0.000000e+00> : vector<2x8x32xf32>
    %28 = tpu.matmul %0, %27, %cst_19 {dimension_numbers = #tpu.dot_dimension_numbers<[2], [0], [0, 1], [1], [0, 0, 0, 1, 1, 1], [], []>} : vector<2x8x32xf32>, vector<32x32xf32>, vector<2x8x32xf32> -> vector<2x8x32xf32>
    "tpu.trace_stop"() : () -> ()
    %c0_20 = arith.constant 0 : index
    %c0_21 = arith.constant 0 : index
    %c0_22 = arith.constant 0 : index
    %29 = vector.load %arg7[%c0_20, %c0_21, %c0_22] : memref<1x1x32xf32, #tpu.memory_space<vmem>>, vector<1x1x32xf32>
    %30 = vector.broadcast %29 : vector<1x1x32xf32> to vector<2x8x32xf32>
    %31 = arith.addf %28, %30 : vector<2x8x32xf32>
    %32 = vector.broadcast %26 : vector<2x1x32xf32> to vector<2x8x32xf32>
    %33 = arith.mulf %31, %32 : vector<2x8x32xf32>
    %c0_23 = arith.constant 0 : index
    %c0_24 = arith.constant 0 : index
    %34 = vector.load %arg8[%c0_23, %c0_24] : memref<32x32xf32, #tpu.memory_space<vmem>>, vector<32x32xf32>
    "tpu.trace_start"() <{level = 10 : i32, message = "bnd,de->bne"}> : () -> ()
    %cst_25 = arith.constant dense<0.000000e+00> : vector<2x8x32xf32>
    %35 = tpu.matmul %33, %34, %cst_25 {dimension_numbers = #tpu.dot_dimension_numbers<[2], [0], [0, 1], [1], [0, 0, 0, 1, 1, 1], [], []>} : vector<2x8x32xf32>, vector<32x32xf32>, vector<2x8x32xf32> -> vector<2x8x32xf32>
    "tpu.trace_stop"() : () -> ()
    %c0_26 = arith.constant 0 : index
    %c0_27 = arith.constant 0 : index
    %c0_28 = arith.constant 0 : index
    %36 = vector.load %arg9[%c0_26, %c0_27, %c0_28] : memref<1x1x32xf32, #tpu.memory_space<vmem>>, vector<1x1x32xf32>
    %37 = vector.broadcast %36 : vector<1x1x32xf32> to vector<2x8x32xf32>
    %38 = arith.addf %35, %37 : vector<2x8x32xf32>
    %c0_29 = arith.constant 0 : index
    %c0_30 = arith.constant 0 : index
    %c0_31 = arith.constant 0 : index
    %39 = vector.load %arg10[%c0_29, %c0_30, %c0_31] : memref<2x8x32xf32, #tpu.memory_space<vmem>>, vector<2x8x32xf32>
    tpu.vector_store %arg10[%c0_29, %c0_30, %c0_31], %38 {strides = array<i32>} : memref<2x8x32xf32, #tpu.memory_space<vmem>>, vector<2x8x32xf32>,
    return
  }
  func.func @transform_0(%arg0: i32) -> (i32, i32, i32) {
    %c0_i32 = arith.constant 0 : i32
    %c0_i32_0 = arith.constant 0 : i32
    %c0_i32_1 = arith.constant 0 : i32
    return %arg0, %c0_i32, %c0_i32_0 : i32, i32, i32
  }
  func.func @transform_1(%arg0: i32) -> (i32, i32, i32) {
    %c0_i32 = arith.constant 0 : i32
    %c0_i32_0 = arith.constant 0 : i32
    %c0_i32_1 = arith.constant 0 : i32
    %c0_i32_2 = arith.constant 0 : i32
    return %c0_i32, %c0_i32_0, %c0_i32_1 : i32, i32, i32
  }
  func.func @transform_2(%arg0: i32) -> (i32, i32, i32) {
    %c0_i32 = arith.constant 0 : i32
    %c0_i32_0 = arith.constant 0 : i32
    %c0_i32_1 = arith.constant 0 : i32
    %c0_i32_2 = arith.constant 0 : i32
    return %c0_i32, %c0_i32_0, %c0_i32_1 : i32, i32, i32
  }
  func.func @transform_3(%arg0: i32) -> (i32, i32) {
    %c0_i32 = arith.constant 0 : i32
    %c0_i32_0 = arith.constant 0 : i32
    %c0_i32_1 = arith.constant 0 : i32
    return %c0_i32, %c0_i32_0 : i32, i32
  }
  func.func @transform_4(%arg0: i32) -> (i32, i32, i32) {
    %c0_i32 = arith.constant 0 : i32
    %c0_i32_0 = arith.constant 0 : i32
    %c0_i32_1 = arith.constant 0 : i32
    %c0_i32_2 = arith.constant 0 : i32
    return %c0_i32, %c0_i32_0, %c0_i32_1 : i32, i32, i32
  }
  func.func @transform_5(%arg0: i32) -> (i32, i32) {
    %c0_i32 = arith.constant 0 : i32
    %c0_i32_0 = arith.constant 0 : i32
    %c0_i32_1 = arith.constant 0 : i32
    return %c0_i32, %c0_i32_0 : i32, i32
  }
  func.func @transform_6(%arg0: i32) -> (i32, i32, i32) {
    %c0_i32 = arith.constant 0 : i32
    %c0_i32_0 = arith.constant 0 : i32
    %c0_i32_1 = arith.constant 0 : i32
    %c0_i32_2 = arith.constant 0 : i32
    return %c0_i32, %c0_i32_0, %c0_i32_1 : i32, i32, i32
  }
  func.func @transform_7(%arg0: i32) -> (i32, i32) {
    %c0_i32 = arith.constant 0 : i32
    %c0_i32_0 = arith.constant 0 : i32
    %c0_i32_1 = arith.constant 0 : i32
    return %c0_i32, %c0_i32_0 : i32, i32
  }
  func.func @transform_8(%arg0: i32) -> (i32, i32, i32) {
    %c0_i32 = arith.constant 0 : i32
    %c0_i32_0 = arith.constant 0 : i32
    %c0_i32_1 = arith.constant 0 : i32
    %c0_i32_2 = arith.constant 0 : i32
    return %c0_i32, %c0_i32_0, %c0_i32_1 : i32, i32, i32
  }
  func.func @transform_9(%arg0: i32) -> (i32, i32, i32) {
    %c0_i32 = arith.constant 0 : i32
    %c0_i32_0 = arith.constant 0 : i32
    %c0_i32_1 = arith.constant 0 : i32
    return %arg0, %c0_i32, %c0_i32_0 : i32, i32, i32
  }
}

</mosaic_0001>

<bundles_post_ra>
// kernel: tpu_custom_call.1
= control target key start
LH: loop header
LB: loop body
LE: loop exit
PB: predicated region body
PF: predicated region fallthrough
CT: control target
= control target key end

     0   :  { %s650_s0 = inlined_call_operand.hbm [shape: f32[2,8,32], index: 0, kind: input, shape index: {}]   ;;  %s651_s1 = inlined_call_operand.vmem [shape: f32[1,1,32], index: 1, kind: input, shape index: {}]   ;;  %s652_s2 = inlined_call_operand.<no memory space> [shape: f32[1,1,1], index: 2, kind: input, shape index: {}]   ;;  %s653_s3 = inlined_call_operand.hbm [shape: f32[32,32], index: 3, kind: input, shape index: {}]   ;;  %s654_s4 = inlined_call_operand.vmem [shape: f32[1,1,32], index: 4, kind: input, shape index: {}]   ;;  %s655_s5 = inlined_call_operand.hbm [shape: f32[32,32], index: 5, kind: input, shape index: {}]   ;;  %s656_s6 = inlined_call_operand.vmem [shape: f32[1,1,32], index: 6, kind: input, shape index: {}]   ;;  %s657_s7 = inlined_call_operand.hbm [shape: f32[32,32], index: 7, kind: input, shape index: {}]   ;;  %s658_s8 = inlined_call_operand.vmem [shape: f32[1,1,32], index: 8, kind: input, shape index: {}]   ;;  %s659_s9 = inlined_call_operand.hbm [shape: f32[2,8,32], index: 9, kind: output, shape index: {}]  }
   0x1   :  { %v14_v0 = vstv %s652_s2 }
   0x2   :  { %15 = vst [vmem:[#allocation2] sm:$0x1] %v14_v0 }
   0x3   :  { %16 = vsyncpa [#allocation4], 0 }
   0x4   :  { %17 = vsyncpa [#allocation7], 0 }
   0x5   :  { %18 = vsyncpa [#allocation10], 0 }
   0x6   :  { %19 = vsyncpa [#allocation5], 0  ;;  %s41_s13 = sshll.u32 %s653_s3, 4  ;;  %s522_s14 = smov [#allocation6]   ;;  %s42_s13 = int_to_ptr.hbm [resolvable:$true] %s41_s13 }
   0x7   :  { %s43_s15 = sshll.u32 %s522_s14, 4  ;;  %s24_s18 = sshll.u32 %s650_s0, 4  ;;  %s44_s15 = int_to_ptr.vmem [resolvable:$true] %s43_s15  ;;  %s25_s18 = int_to_ptr.hbm [resolvable:$true] %s24_s18 }
   0x8   :  { %s523_s19 = smov 128   ;;  %s524_s20 = smov 8  }
   0x9   :  { %49 = dma.hbm_to_vmem [thread:$0]  %s42_s13, 512, %s44_s15, [#allocation7], %s523_s19, %s523_s19, %s524_s20  }
   0xa   :  { %s525_s2 = smov [#allocation3]   ;;  %s56_s3 = sshll.u32 %s655_s5, 4  ;;  %s57_s3 = int_to_ptr.hbm [resolvable:$true] %s56_s3 }
   0xb   :  { %s26_s21 = sshll.u32 %s525_s2, 4  ;;  %s71_s25 = sshll.u32 %s657_s7, 4  ;;  %s27_s21 = int_to_ptr.vmem [resolvable:$true] %s26_s21  ;;  %s72_s25 = int_to_ptr.hbm [resolvable:$true] %s71_s25 }
   0xc   :  { %32 = dma.hbm_to_vmem [thread:$0]  %s25_s18, 256, %s27_s21, [#allocation4], %s523_s19, %s523_s19, %s524_s20  }
   0xd   :  { %s526_s26 = smov [#allocation8]   ;;  %s527_s28 = smov [#allocation9]  }
   0xe   :  { %s58_s27 = sshll.u32 %s526_s26, 4  ;;  %s73_s5 = sshll.u32 %s527_s28, 4  ;;  %s59_s27 = int_to_ptr.vmem [resolvable:$true] %s58_s27  ;;  %s74_s5 = int_to_ptr.vmem [resolvable:$true] %s73_s5 }
   0xf   :  { %64 = dma.hbm_to_vmem [thread:$0]  %s57_s3, 512, %s59_s27, [#allocation7], %s523_s19, %s523_s19, %s524_s20  }
  0x10   :  { %79 = dma.hbm_to_vmem [thread:$0]  %s72_s25, 512, %s74_s5, [#allocation10], %s523_s19, %s523_s19, %s524_s20  }
  0x11   :  { %514 = dma.done.wait [#allocation4], 256  }
  0x12   :  { %515 = vsyncadd [#allocation4], 4294967040 }
  0x13   :  { %516 = dma.done.wait [#allocation7], 1024  }
  0x14   :  { %517 = vsyncadd [#allocation7], 4294966272 }
  0x15   :  { %518 = dma.done.wait [#allocation10], 512  }
  0x16   :  { %519 = vsyncadd [#allocation10], 4294966784  ;;  %v607_v1 = vld [vmem:[#allocation3] sm:$0xff]  ;;  %v382_v2 = vld [vmem:[%s651_s1] ss:$0 sm:$0xff]  ;;  %vm106_vm0 = vcmask 261120  }
  0x17   :  { %v104_v3 = vmul.f32 %v382_v2, %v607_v1  ;;  %v613_v4 = vld [vmem:[#allocation3 + $0x8] sm:$0xff]  ;;  %v528_v8 = vmov 0   ;;  %v383_v9 = vld [vmem:[#allocation2] ss:$0 sm:$0xff]  ;;  %vm119_vm1 = vcmask 7168   ;;  %v261_v51 = vld [vmem:[#allocation8 + $0x10] sm:$0xff] }
  0x18   :  { %v105_v6 = vmul.f32 %v382_v2, %v613_v4  ;;  %380 = vset.pattern.permute.xlu2 %v528_v8  ;;  %379 = vset.pattern.permute.xlu1 %v528_v8  ;;  %v262_v49 = vld [vmem:[#allocation8 + $0x18] sm:$0xff]  ;;  %v222_v52 = vld [vmem:[#allocation6 + $0x10] sm:$0xff]  ;;  %v260_v53 = vld [vmem:[#allocation8 + $0x8] sm:$0xff]  ;;  %vm227_vm10 = vcmask 1041409   ;;  %s347_s16 = sshll.u32 %s659_s9, 4  ;;  %s348_s16 = int_to_ptr.hbm [resolvable:$true] %s347_s16 }
  0x19   :  { %v107_v5 = vsel %vm106_vm0, %v104_v3, 0.0  ;;  %381 = vset.pattern.permute.xlu0 %v528_v8  ;;  %367 = vmatpush.msra.mxu3 %v262_v49  ;;  %v223_v50 = vld [vmem:[#allocation6 + $0x18] sm:$0xff]  ;;  %v221_v54 = vld [vmem:[#allocation6 + $0x8] sm:$0xff]  ;;  %v259_v55 = vld [vmem:[#allocation8] sm:$0xff] }
  0x1a   :  { %108 = vadd.xlane.f32.xlu0 %v107_v5  ;;  %v110_v7 = vsel %vm106_vm0, %v105_v6, 0.0  ;;  %285 = vmatpush.msra.mxu1 %v262_v49  ;;  %v220_v57 = vld [vmem:[#allocation6] sm:$0xff] }
  0x1b   :  { %249 = vmatpush.msra.mxu0 %v223_v50  ;;  %368 = vmatpush.msra.mxu3 %v261_v51  ;;  %v224_v60 = vld [vmem:[%s654_s4] sm:$0x1] }
  0x1c   :  { %286 = vmatpush.msra.mxu1 %v261_v51  ;;  %230 = vst [vmem:[#allocation1] ss:$9 sm:$0xff] %v224_v60 }
  0x1d   :  { %250 = vmatpush.msra.mxu0 %v222_v52  ;;  %369 = vmatpush.msra.mxu3 %v260_v53  ;;  %232 = vst [vmem:[#allocation1 + $0x1] ss:$9 sm:$0xff] %v224_v60 }
  0x1e   :  { %287 = vmatpush.msra.mxu1 %v260_v53  ;;  %v385_v53 = vld [vmem:[%s658_s8] ss:$0 sm:$0xff] }
  0x1f   :  { %251 = vmatpush.msra.mxu0 %v221_v54  ;;  %370 = vmatpush.msra.mxu3 %v259_v55 }
  0x20   :  { %364 = vmatmul.msk.f32.vlgmr.msra.gmra.mxu3 %vm106_vm0, %v613_v4  ;;  %288 = vmatpush.msra.mxu1 %v259_v55 }
  0x21   :  { %252 = vmatpush.msra.mxu0 %v220_v57  ;;  %363 = vmatmul.msk.f32.vlgmr.msra.gmra.mxu1 %vm106_vm0, %v607_v1 }
  0x22   :  { %111 = vadd.xlane.f32.xlu0 %v110_v7 }
  0x8d   :  { %v109_v10 = vpop.xlane.xlu0 %108 }
  0x8e   :  { %v117_v11 = vadd.f32 %v383_v9, %v109_v10 }
  0x90   :  { %v120_v12 = vsel %vm119_vm1, %v117_v11, -inf }
  0x91   :  { %v121_v13 = vrot.slane %v120_v12, 4 }
  0x93   :  { %v122_v14 = vmax.f32 %v120_v12, %v121_v13 }
  0x95   :  { %v123_v15 = vrot.slane %v122_v14, 2  ;;  %v112_v16 = vpop.xlane.xlu0 %111 }
  0x96   :  { %v118_v17 = vadd.f32 %v383_v9, %v112_v16 }
  0x97   :  { %v124_v18 = vmax.f32 %v122_v14, %v123_v15 }
  0x98   :  { %v127_v19 = vsel %vm119_vm1, %v118_v17, -inf }
  0x99   :  { %v125_v20 = vrot.slane %v124_v18, 1  ;;  %v128_v21 = vrot.slane %v127_v19, 4 }
  0x9b   :  { %v126_v22 = vmax.f32 %v124_v18, %v125_v20  ;;  %v129_v23 = vmax.f32 %v127_v19, %v128_v21 }
  0x9d   :  { %v134_v24 = vsub.f32 %v117_v11, %v126_v22  ;;  %v130_v25 = vrot.slane %v129_v23, 2 }
  0x9f   :  { %v136_v26 = vmul.f32 1.442695, %v134_v24  ;;  %v131_v27 = vmax.f32 %v129_v23, %v130_v25 }
  0xa1   :  { %386 = vpow2.f32 %v136_v26  ;;  %v132_v28 = vrot.slane %v131_v27, 1 }
  0xa3   :  { %v133_v29 = vmax.f32 %v131_v27, %v132_v28  ;;  %v293_v49 = vpop.f32.mrf.mxu3 }
  0xa5   :  { %v135_v30 = vsub.f32 %v118_v17, %v133_v29 }
  0xa7   :  { %v387_v31 = vpop.eup %386  ;;  %v138_v32 = vmul.f32 1.442695, %v135_v30 }
  0xa8   :  { %156 = vperm.xlu2 %380, %v387_v31   ;;  %v140_v33 = vsel %vm119_vm1, %v387_v31, 0.0 }
  0xa9   :  { %388 = vpow2.f32 %v138_v32  ;;  %v141_v34 = vrot.slane %v140_v33, 4 }
  0xab   :  { %v142_v35 = vadd.f32 %v141_v34, %v140_v33 }
  0xad   :  { %v143_v36 = vrot.slane %v142_v35, 2 }
  0xaf   :  { %v389_v37 = vpop.eup %388  ;;  %v144_v38 = vadd.f32 %v143_v36, %v142_v35  ;;  %v305_v36 = vld [vmem:[#allocation9 + $0x18] sm:$0xff] }
  0xb0   :  { %161 = vperm.xlu2 %380, %v389_v37   ;;  %v147_v39 = vsel %vm119_vm1, %v389_v37, 0.0  ;;  %328 = vmatpush.msra.mxu2 %v305_v36  ;;  %v304_v37 = vld [vmem:[#allocation9 + $0x10] sm:$0xff] }
  0xb1   :  { %v145_v40 = vrot.slane %v144_v38, 1  ;;  %v148_v41 = vrot.slane %v147_v39, 4 }
  0xb2   :  { %329 = vmatpush.msra.mxu2 %v304_v37 }
  0xb3   :  { %v146_v42 = vadd.f32 %v145_v40, %v144_v38  ;;  %v149_v43 = vadd.f32 %v148_v41, %v147_v39  ;;  %v303_v38 = vld [vmem:[#allocation9 + $0x8] sm:$0xff]  ;;  %v302_v39 = vld [vmem:[#allocation9] sm:$0xff] }
  0xb4   :  { %330 = vmatpush.msra.mxu2 %v303_v38  ;;  %v384_v40 = vld [vmem:[%s656_s6] ss:$0 sm:$0xff]  ;;  %s529_s6 = smov [#allocation11]  }
  0xb5   :  { %182 = vperm.xlu1 %379, %v146_v42   ;;  %v150_v44 = vrot.slane %v149_v43, 2  ;;  %v233_v41 = vld [vmem:[#allocation1] sm:$0xff]  ;;  %v290_v42 = vpop.f32.mrf.mxu1  ;;  %v294_v51 = vadd.f32 %v384_v40, %v293_v49  ;;  %s345_s13 = sshll.u32 %s529_s6, 4  ;;  %s346_s13 = int_to_ptr.vmem [resolvable:$true] %s345_s13 }
  0xb6   :  { %331 = vmatpush.msra.mxu2 %v302_v39 }
  0xb7   :  { %v151_v45 = vadd.f32 %v150_v44, %v149_v43 }
  0xb9   :  { %v152_v46 = vrot.slane %v151_v45, 1 }
  0xbb   :  { %v153_v47 = vadd.f32 %v152_v46, %v151_v45  ;;  %v291_v45 = vadd.f32 %v384_v40, %v290_v42 }
  0xbd   :  { %187 = vperm.xlu1 %379, %v153_v47  }
 0x102   :  { %v157_v48 = vpop.permute.xlu2 %156 }
 0x103   :  { %v164_v58 = vmul.f32 %v157_v48, %v607_v1 }
 0x105   :  { %v166_v61 = vsel %vm106_vm0, %v164_v58, 0.0 }
 0x106   :  { %v167_v0 = vrot.slane %v166_v61, 4 }
 0x10a   :  { %v162_v56 = vpop.permute.xlu2 %161 }
 0x10b   :  { %v165_v59 = vmul.f32 %v162_v56, %v613_v4  ;;  %v168_v4 = vadd.f32 %v167_v0, %v166_v61 }
 0x10d   :  { %v173_v62 = vsel %vm106_vm0, %v165_v59, 0.0  ;;  %v169_v8 = vrot.slane %v168_v4, 2 }
 0x10e   :  { %v174_v2 = vrot.slane %v173_v62, 4 }
 0x10f   :  { %v170_v12 = vadd.f32 %v169_v8, %v168_v4 }
 0x110   :  { %v175_v5 = vadd.f32 %v174_v2, %v173_v62 }
 0x111   :  { %v171_v19 = vrot.slane %v170_v12, 1 }
 0x112   :  { %v176_v9 = vrot.slane %v175_v5, 2 }
 0x113   :  { %v172_v29 = vadd.f32 %v171_v19, %v170_v12 }
 0x114   :  { %v177_v13 = vadd.f32 %v176_v9, %v175_v5 }
 0x116   :  { %v178_v20 = vrot.slane %v177_v13, 1 }
 0x118   :  { %v179_v30 = vadd.f32 %v178_v20, %v177_v13 }
 0x127   :  { %v183_v63 = vpop.permute.xlu1 %182 }
 0x128   :  { %390 = vrcp.f32 %v183_v63  ;;  %v201_v16 = vand.u32 2147483648, %v183_v63  ;;  %vm195_vm3 = vweird.f32 %v183_v63  ;;  %v199_v17 = vand.u32 2147483647, %v183_v63 }
 0x12a   :  { %v202_v25 = vor.u32 1.1754944e-38, %v201_v16  ;;  %vm200_vm6 = vcmp.eq.f32.partialorder %v199_v17, 8.507059e+37 }
 0x12e   :  { %v391_v3 = vpop.eup %390 }
 0x12f   :  { %v191_v6 = vmul.f32 %v391_v3, %v183_v63  ;;  %v188_v7 = vpop.permute.xlu1 %187  ;;  %vm196_vm2 = vweird.f32 %v391_v3 }
 0x130   :  { %392 = vrcp.f32 %v188_v7  ;;  %vm197_vm4 = vmor %vm195_vm3, %vm196_vm2  ;;  %v216_v21 = vand.u32 2147483648, %v188_v7  ;;  %v214_v23 = vand.u32 2147483647, %v188_v7  ;;  %vm210_vm7 = vweird.f32 %v188_v7 }
 0x131   :  { %v192_v1 = vsub.f32 1.0, %v191_v6 }
 0x132   :  { %v217_v27 = vor.u32 1.1754944e-38, %v216_v21  ;;  %vm215_vm9 = vcmp.eq.f32.partialorder %v214_v23, 8.507059e+37 }
 0x133   :  { %v193_v10 = vmul.f32 %v391_v3, %v192_v1 }
 0x135   :  { %v194_v14 = vadd.f32 %v391_v3, %v193_v10 }
 0x136   :  { %v393_v11 = vpop.eup %392 }
 0x137   :  { %v206_v15 = vmul.f32 %v393_v11, %v188_v7  ;;  %vm211_vm5 = vweird.f32 %v393_v11  ;;  %v198_v24 = vsel %vm197_vm4, %v391_v3, %v194_v14 }
 0x138   :  { %vm212_vm8 = vmor %vm210_vm7, %vm211_vm5  ;;  %v203_v28 = vsel %vm200_vm6, %v202_v25, %v198_v24 }
 0x139   :  { %v207_v18 = vsub.f32 1.0, %v206_v15  ;;  %v204_v33 = vmul.f32 %v203_v28, %v172_v29 }
 0x13b   :  { %v208_v22 = vmul.f32 %v393_v11, %v207_v18 }
 0x13d   :  { %v209_v26 = vadd.f32 %v393_v11, %v208_v22 }
 0x13f   :  { %v213_v31 = vsel %vm212_vm8, %v393_v11, %v209_v26 }
 0x140   :  { %v218_v32 = vsel %vm215_vm9, %v217_v27, %v213_v31 }
 0x141   :  { %v219_v34 = vmul.f32 %v218_v32, %v179_v30 }
 0x143   :  { %v228_v35 = vsel %vm227_vm10, %v219_v34, %v204_v33 }
 0x144   :  { %362 = vmatmul.msk.f32.vlgmr.msra.gmra.mxu0 %vm106_vm0, %v228_v35 }
 0x1c1   :  { %v254_v43 = vpop.f32.mrf.mxu0 }
 0x1c2   :  { %v255_v44 = vadd.f32 %v254_v43, %v233_v41 }
 0x1c4   :  { %v296_v46 = vperm.slane %v255_v44, 0  ;;  %v258_v47 = vrot.slane %v255_v44, 1 }
 0x1c6   :  { %v300_v48 = vmul.f32 %v296_v46, %v291_v45  ;;  %v297_v50 = vperm.slane %v258_v47, 0 }
 0x1c8   :  { %365 = vmatmul.msk.f32.vlgmr.msra.gmra.mxu2 %vm106_vm0, %v300_v48  ;;  %v301_v52 = vmul.f32 %v297_v50, %v294_v51 }
 0x1d0   :  { %366 = vmatmul.msk.f32.gmra.mxu2 %vm106_vm0, %v301_v52 }
 0x24b   :  { %v333_v54 = vpop.f32.mrf.mxu2 }
 0x24c   :  { %v334_v55 = vadd.f32 %v385_v53, %v333_v54 }
 0x24e   :  { %339 = vst.msk [vmem:[#allocation11] sm:$0xff] %vm106_vm0, %v334_v55 }
 0x253   :  { %v336_v56 = vpop.f32.mrf.mxu2 }
 0x254   :  { %v337_v57 = vadd.f32 %v385_v53, %v336_v56 }
 0x256   :  { %340 = vst.msk [vmem:[#allocation11 + $0x8] sm:$0xff] %vm106_vm0, %v337_v57 }
 0x257   :  { %353 = dma.vmem_to_hbm [thread:$0]  %s346_s13, 256, %s348_s16, [#allocation5], %s523_s19, %s523_s19, %s524_s20  }
 0x258   :  { %520 = dma.done.wait [#allocation5], 256  }
 0x259   :  { %521 = vsyncadd [#allocation5], 4294967040 }
 0x25a   :  { %358 = vsyncpa [#allocation4], 1 }
 0x25b   :  { %359 = vsyncpa [#allocation7], 1 }
 0x25c   :  { %360 = vsyncpa [#allocation10], 1 }
 0x25d   :  { %361 = vsyncpa [#allocation5], 1 }

</bundles_post_ra>
